<compile_context>
chip_gen: v7x
topology: tpu7x:2x2x1
jax: 0.10.0
libtpu: 0.0.40
codegen_flags: <defaults>
</compile_context>

<pallas_src>
import jax
import jax.numpy as jnp
from jax.experimental import pallas as pl
from jax.experimental.pallas import tpu as pltpu

_LANES = 128     # vreg lane width
_SUBLANES = 8    # f32 vreg sublane count


def h_sigmoid_kernel(x_ref, o_ref):
    # h_sigmoid(x) = relu6(x + 3) / 6, computed in the input's native dtype.
    x = x_ref[...]
    o_ref[...] = (jnp.clip(x + 3.0, 0.0, 6.0) / 6.0).astype(o_ref.dtype)


def h_sigmoid(x, *, target_block_bytes=2 * 1024 * 1024):
    """Elementwise hard-sigmoid over an arbitrarily shaped array."""
    orig_shape = x.shape
    dtype = x.dtype
    total = x.size
    if total == 0:
        return x

    itemsize = jnp.dtype(dtype).itemsize
    # Sub-32-bit dtypes pack along sublanes: bf16 native tile is (16,128),
    # int8/fp8 is (32,128). Align row counts to the packed tile.
    sublane_align = max(_SUBLANES, 32 // itemsize)

    # --- lane-dense flattening: (total,) -> (rows, 128) ---
    rows = pl.cdiv(total, _LANES)

    # ~2 MiB per block buffer (mem-bound sweet spot); with double-buffered
    # in + out that is ~8 MiB live VMEM, safe under every generation's
    # scoped-VMEM default (incl. v5e's 16 MiB).
    max_rows = max(sublane_align, target_block_bytes // (_LANES * itemsize))
    block_rows = min(rows, max_rows)
    block_rows = pl.cdiv(block_rows, sublane_align) * sublane_align

    # For large inputs expose >=4 grid steps (>=2 per TensorCore on v7x) so
    # the auto-pipeline overlaps DMA with compute on every core.
    if pl.cdiv(rows, block_rows) < 4 and rows >= 4 * sublane_align:
        block_rows = pl.cdiv(pl.cdiv(rows, 4), sublane_align) * sublane_align

    padded_rows = pl.cdiv(rows, block_rows) * block_rows
    padded_total = padded_rows * _LANES

    xf = jnp.ravel(x)                      # metadata-only for contiguous input
    needs_pad = padded_total != total
    if needs_pad:                          # slow path: one extra HBM pass each way
        xf = jnp.pad(xf, (0, padded_total - total))
    x2 = xf.reshape(padded_rows, _LANES)

    grid = (padded_rows // block_rows,)

    out2 = pl.pallas_call(
        h_sigmoid_kernel,
        out_shape=jax.ShapeDtypeStruct((padded_rows, _LANES), dtype),
        grid_spec=pltpu.PrefetchScalarGridSpec(
            num_scalar_prefetch=0,
            grid=grid,
            in_specs=[pl.BlockSpec((block_rows, _LANES), lambda i: (i, 0))],
            out_specs=pl.BlockSpec((block_rows, _LANES), lambda i: (i, 0)),
        ),
        compiler_params=pltpu.CompilerParams(
            dimension_semantics=("parallel",)),
        cost_estimate=pl.CostEstimate(
            flops=3 * padded_total,
            transcendentals=0,
            bytes_accessed=2 * padded_total * itemsize),
    )(x2)

    if needs_pad:
        return out2.reshape(-1)[:total].reshape(orig_shape)
    return out2.reshape(orig_shape)


def h_sigmoid_reference(x):
    """Pure-JAX reference matching PyTorch relu6(x + 3) / 6."""
    return jnp.clip(x + 3.0, 0.0, 6.0) / 6.0


if __name__ == "__main__":
    key = jax.random.PRNGKey(0)

    # Aligned case (fast path: no pad / no output slice).
    N, C, H, W = 2, 4, 16, 16
    x = 4.0 * jax.random.normal(key, (N, C, H, W), jnp.float32)
    out = jax.block_until_ready(h_sigmoid(x))
    ref = h_sigmoid_reference(x)
    assert out.shape == x.shape and out.dtype == x.dtype
    assert jnp.allclose(out, ref, atol=1e-6, rtol=1e-6), "mismatch (aligned)"

    # Unaligned case (exercises the pad + slice fallback path).
    key2 = jax.random.PRNGKey(1)
    y = 4.0 * jax.random.normal(key2, (3, 5, 7), jnp.float32)
    out_y = jax.block_until_ready(h_sigmoid(y))
    ref_y = h_sigmoid_reference(y)
    assert out_y.shape == y.shape and out_y.dtype == y.dtype
    assert jnp.allclose(out_y, ref_y, atol=1e-6, rtol=1e-6), "mismatch (unaligned)"

    # TODO(synk): PyTorch's inplace=True ReLU6 has no meaning in JAX's
    # functional model; the out-of-place result is numerically identical.

    print("KERNEL_OK")
</pallas_src>

<mosaic_0001>
module attributes {stable_mosaic.version = 11 : i64} {
  func.func @h_sigmoid_kernel(%arg0: i32, %arg1: memref<16x128xf32, #tpu.memory_space<vmem>>, %arg2: memref<16x128xf32, #tpu.memory_space<vmem>>) attributes {dimension_semantics = [#tpu.dimension_semantics<parallel>], iteration_bounds = array<i64: 1>, scalar_prefetch = 0 : i64, scratch_operands = 0 : i64, tpu.core_type = #tpu.core_type<tc>, window_params = [{transform_indices = @transform_0, window_bounds = array<i64: 16, 128>}, {transform_indices = @transform_1, window_bounds = array<i64: 16, 128>}]} {
    %c0 = arith.constant 0 : index
    %c0_0 = arith.constant 0 : index
    %0 = vector.load %arg1[%c0, %c0_0] : memref<16x128xf32, #tpu.memory_space<vmem>>, vector<16x128xf32>
    %cst = arith.constant 3.000000e+00 : f32
    %1 = vector.broadcast %cst : f32 to vector<16x128xf32>
    %2 = arith.addf %0, %1 : vector<16x128xf32>
    %cst_1 = arith.constant 0.000000e+00 : f32
    %cst_2 = arith.constant 6.000000e+00 : f32
    %3 = vector.broadcast %cst_1 : f32 to vector<16x128xf32>
    %4 = arith.maximumf %3, %2 : vector<16x128xf32>
    %5 = vector.broadcast %cst_2 : f32 to vector<16x128xf32>
    %6 = arith.minimumf %5, %4 : vector<16x128xf32>
    %cst_3 = arith.constant 6.000000e+00 : f32
    %7 = vector.broadcast %cst_3 : f32 to vector<16x128xf32>
    %8 = arith.divf %6, %7 : vector<16x128xf32>
    %c0_4 = arith.constant 0 : index
    %c0_5 = arith.constant 0 : index
    %9 = vector.load %arg2[%c0_4, %c0_5] : memref<16x128xf32, #tpu.memory_space<vmem>>, vector<16x128xf32>
    tpu.vector_store %arg2[%c0_4, %c0_5], %8 {strides = array<i32>} : memref<16x128xf32, #tpu.memory_space<vmem>>, vector<16x128xf32>,
    return
  }
  func.func @transform_0(%arg0: i32) -> (i32, i32) {
    %c0_i32 = arith.constant 0 : i32
    %c0_i32_0 = arith.constant 0 : i32
    return %arg0, %c0_i32 : i32, i32
  }
  func.func @transform_1(%arg0: i32) -> (i32, i32) {
    %c0_i32 = arith.constant 0 : i32
    %c0_i32_0 = arith.constant 0 : i32
    return %arg0, %c0_i32 : i32, i32
  }
}

</mosaic_0001>

<bundles_post_ra>
// kernel: tpu_custom_call.1
= control target key start
LH: loop header
LB: loop body
LE: loop exit
PB: predicated region body
PF: predicated region fallthrough
CT: control target
= control target key end

     0   :  { %6 = vsyncpa [#allocation3], 0  ;;  %s149_s0 = inlined_call_operand.hbm [shape: f32[16,128], index: 0, kind: input, shape index: {}]   ;;  %s150_s1 = inlined_call_operand.hbm [shape: f32[16,128], index: 1, kind: output, shape index: {}]  }
   0x1   :  { %7 = vsyncpa [#allocation4], 0  ;;  %s105_s6 = smov [#allocation2]   ;;  %s57_s10 = scalar_lea.hbm %s149_s0, 256 }
   0x2   :  { %s13_s7 = sshll.u32 %s105_s6, 4  ;;  %p58_p0 = scmp.ne.s32.totalorder %s149_s0, %s57_s10  ;;  %s14_s7 = int_to_ptr.vmem [resolvable:$true] %s13_s7 }
   0x3   :  { %p61_p1 = scmp.lt.u32.totalorder %s57_s10, %s149_s0 }
   0x5   :  { %p63_p2 = pnand %p61_p1, %p58_p0 }
   0x7   :  { %66 = shalt.err (!%p63_p2)
}
   0x8   :  { %s67_s15 = scalar_lea.vmem %s14_s7, 256  ;;  %p72_p4 = scmp.lt.s32.totalorder %s14_s7, %s14_s7 }
   0x9   :  { %p68_p3 = scmp.ne.s32.totalorder %s14_s7, %s67_s15  ;;  %p73_p5 = scmp.lt.s32.totalorder %s67_s15, %s67_s15 }
   0xb   :  { %p74_p6 = por %p73_p5, %p72_p4 }
   0xd   :  { %p75_p7 = pnand %p74_p6, %p68_p3 }
   0xf   :  { %78 = shalt.err (!%p75_p7)
}
  0x10   :  { %s106_s16 = smov 128   ;;  %s107_s17 = smov 8  }
  0x11   :  { %19 = dma.hbm_to_vmem [thread:$0]  %s149_s0, 256, %s14_s7, [#allocation3], %s106_s16, %s106_s16, %s107_s17  }
  0x12   :  { %101 = dma.done.wait [#allocation3], 256  }
  0x13   :  { %102 = vsyncadd [#allocation3], 4294967040  ;;  %v23_v0 = vld [vmem:[#allocation2] sm:$0xff]  ;;  %v24_v1 = vld [vmem:[#allocation2 + $0x8] sm:$0xff]  ;;  %s108_s20 = smov [#allocation5]  }
  0x14   :  { %v25_v2 = vadd.f32 3.0, %v23_v0  ;;  %v26_v3 = vadd.f32 3.0, %v24_v1  ;;  %s41_s21 = sshll.u32 %s108_s20, 4  ;;  %s42_s21 = int_to_ptr.vmem [resolvable:$true] %s41_s21 }
  0x15   :  { %s79_s22 = scalar_lea.vmem %s42_s21, 256  ;;  %p84_p9 = scmp.lt.s32.totalorder %s42_s21, %s42_s21 }
  0x16   :  { %v27_v4 = vmax.f32 %v25_v2, 0.0  ;;  %v28_v5 = vmax.f32 %v26_v3, 0.0  ;;  %p80_p8 = scmp.ne.s32.totalorder %s42_s21, %s79_s22  ;;  %p85_p10 = scmp.lt.s32.totalorder %s79_s22, %s79_s22 }
  0x18   :  { %v29_v6 = vmin.f32 %v27_v4, 6.0  ;;  %v30_v7 = vmin.f32 %v28_v5, 6.0  ;;  %p86_p11 = por %p85_p10, %p84_p9 }
  0x1a   :  { %v32_v8 = vmul.f32 0.16666667, %v29_v6  ;;  %v33_v9 = vmul.f32 0.16666667, %v30_v7  ;;  %p87_p12 = pnand %p86_p11, %p80_p8 }
  0x1c   :  { %34 = vst [vmem:[#allocation5] sm:$0xff] %v32_v8  ;;  %35 = vst [vmem:[#allocation5 + $0x8] sm:$0xff] %v33_v9 }
  0x1d   :  { %90 = shalt.err (!%p87_p12)
}
  0x1e   :  { %s91_s24 = scalar_lea.hbm %s150_s1, 256 }
  0x1f   :  { %p92_p13 = scmp.ne.s32.totalorder %s150_s1, %s91_s24  ;;  %p95_p0 = scmp.lt.u32.totalorder %s91_s24, %s150_s1 }
  0x21   :  { %p97_p1 = pnand %p95_p0, %p92_p13 }
  0x23   :  { %100 = shalt.err (!%p97_p1)
}
  0x24   :  { %47 = dma.vmem_to_hbm [thread:$0]  %s42_s21, 256, %s150_s1, [#allocation4], %s106_s16, %s106_s16, %s107_s17  }
  0x25   :  { %103 = dma.done.wait [#allocation4], 256  }
  0x26   :  { %104 = vsyncadd [#allocation4], 4294967040 }
  0x27   :  { %51 = vsyncpa [#allocation3], 1 }
  0x28   :  { %52 = vsyncpa [#allocation4], 1 }

</bundles_post_ra>
